<compile_context>
chip_gen: v7x
topology: tpu7x:2x2x1
jax: 0.10.0
libtpu: 0.0.40
codegen_flags: <defaults>
</compile_context>

<pallas_src>
import jax
import jax.numpy as jnp
from jax.experimental import pallas as pl
from jax.experimental.pallas import tpu as pltpu

LANES = 128
SUBLANES_F32 = 8
TARGET_BLOCK_BYTES = 4 << 20      # ~4 MiB per operand block (perf review: 2-4 MiB)
VMEM_LIMIT_CAP = 56 << 20         # stay below v7x's 64 MiB physical VMEM


def _wmse_kernel(in_ref, tgt_ref, w_ref, out_ref):
    # f32 math everywhere: required on v5e (no bf16 VPU path) and free on
    # v6e/v7x because the kernel is DMA-bound (VALU slots have huge slack).
    x = in_ref[...].astype(jnp.float32)
    t = tgt_ref[...].astype(jnp.float32)
    w = w_ref[...].astype(jnp.float32)
    d = x - t
    out_ref[...] = (d * d * w).astype(out_ref.dtype)


def _sublanes_for(itemsize):
    # Native tile height: 8 for 4-byte, 16 for 2-byte, 32 for 1-byte dtypes.
    return SUBLANES_F32 * max(1, 4 // max(itemsize, 1))


def _choose_slab(n_elems, itemsize, sublanes):
    """Pick (W, rows, block_rows) for a flat length n_elems (multiple of sublanes*LANES)."""
    # Widest lane-dense last dim that divides the slab and leaves >= sublanes rows.
    W = LANES
    for w in (2048, 1024, 512, 256, 128):
        if n_elems % w == 0 and n_elems // w >= sublanes:
            W = w
            break
    rows = n_elems // W

    # ~TARGET_BLOCK_BYTES per operand; block_rows is a multiple of sublanes.
    target_elems = max(sublanes * LANES, TARGET_BLOCK_BYTES // itemsize)
    block_rows = max(sublanes, (target_elems // W) // sublanes * sublanes)
    block_rows = min(rows, block_rows)

    # Guarantee >= 2 grid steps whenever possible so both v7x TensorCores get
    # work under dimension_semantics=("parallel",). (Partial last blocks are
    # handled by the pipeline; ragged grids stay correct.)
    if rows >= 2 * sublanes:
        half = max(sublanes, (rows // 2) // sublanes * sublanes)
        block_rows = min(block_rows, half)
    return W, rows, block_rows


def weighted_mse_loss(inp, target, weight):
    """Elementwise (inp - target)**2 * weight via a Pallas TPU kernel."""
    assert inp.shape == target.shape == weight.shape
    orig_shape = inp.shape
    out_dtype = jnp.result_type(inp.dtype, target.dtype, weight.dtype)

    n = inp.size
    if n == 0:
        return jnp.zeros(orig_shape, out_dtype)

    dtypes = (inp.dtype, target.dtype, weight.dtype, out_dtype)
    itemsizes = [jnp.dtype(d).itemsize for d in dtypes]
    max_item = max(itemsizes)
    sublanes = _sublanes_for(min(itemsizes))
    chunk = sublanes * LANES            # minimal native tile (1024 elems for f32)

    flat_i = inp.reshape(-1)
    flat_t = target.reshape(-1)
    flat_w = weight.reshape(-1)

    def tail_compute(i, t, w):
        d = i.astype(jnp.float32) - t.astype(jnp.float32)
        return (d * d * w.astype(jnp.float32)).astype(out_dtype)

    n_main = (n // chunk) * chunk
    if n_main == 0:
        # Tiny input (< one native tile): plain fused jnp, no kernel launch.
        return tail_compute(flat_i, flat_t, flat_w).reshape(orig_shape)

    # Aligned prefix goes through the kernel (zero-copy reshape when n_main == n).
    if n_main == n:
        mi, mt, mw = flat_i, flat_t, flat_w
    else:
        mi, mt, mw = flat_i[:n_main], flat_t[:n_main], flat_w[:n_main]

    W, rows, block_rows = _choose_slab(n_main, max_item, sublanes)

    grid = (pl.cdiv(rows, block_rows),)
    spec = pl.BlockSpec((block_rows, W), lambda i: (i, 0))

    # Explicit scoped-VMEM budget: 4 operands x 2 pipeline buffers + headroom,
    # capped so it is valid on every generation (v5e default scoped is only
    # 16 MiB; v7x physical is 64 MiB).
    block_bytes = block_rows * W * sum(itemsizes)   # all 4 operands, one buffer each
    vmem_limit = int(max(32 << 20, min(2 * block_bytes + (8 << 20), VMEM_LIMIT_CAP)))

    cost = pl.CostEstimate(
        flops=3 * n_main,                       # sub + 2 muls per processed element
        transcendentals=0,
        bytes_accessed=n_main * sum(itemsizes),  # 3 reads + 1 write, processed elems
    )

    out_main = pl.pallas_call(
        _wmse_kernel,
        out_shape=jax.ShapeDtypeStruct((rows, W), out_dtype),
        grid_spec=pltpu.PrefetchScalarGridSpec(
            num_scalar_prefetch=0,
            grid=grid,
            in_specs=[spec, spec, spec],
            out_specs=spec,
        ),
        compiler_params=pltpu.CompilerParams(
            dimension_semantics=("parallel",),
            vmem_limit_bytes=vmem_limit,
        ),
        cost_estimate=cost,
    )(mi.reshape(rows, W), mt.reshape(rows, W), mw.reshape(rows, W))

    out_flat = out_main.reshape(-1)
    if n_main != n:
        # <chunk-sized ragged tail: plain fused jnp instead of padded copies of
        # all three inputs (the old pad + output-slice path ~3x'd HBM traffic).
        tail = tail_compute(flat_i[n_main:], flat_t[n_main:], flat_w[n_main:])
        out_flat = jnp.concatenate([out_flat, tail])
    return out_flat.reshape(orig_shape)


if __name__ == "__main__":
    key = jax.random.PRNGKey(0)
    k1, k2, k3 = jax.random.split(key, 3)

    # Small NCHW-shaped tensors matching the PyTorch module's usage
    # (aligned path: 2*4*16*16 = 2048 elements, a multiple of 1024).
    shape = (2, 4, 16, 16)
    inp = jax.random.normal(k1, shape, dtype=jnp.float32)
    tgt = jax.random.normal(k2, shape, dtype=jnp.float32)
    wgt = jax.random.uniform(k3, shape, dtype=jnp.float32)

    out = jax.block_until_ready(weighted_mse_loss(inp, tgt, wgt))
    ref = (inp - tgt) ** 2 * wgt
    assert out.shape == shape
    assert jnp.allclose(out, ref, atol=1e-6, rtol=1e-6), "mismatch vs reference"

    # Unaligned length -> aligned-prefix kernel + tiny jnp tail (no pad copies).
    shape2 = (3, 5, 7, 11)  # 1155 elements, not a multiple of 1024
    i2 = jax.random.normal(k1, shape2, dtype=jnp.float32)
    t2 = jax.random.normal(k2, shape2, dtype=jnp.float32)
    w2 = jax.random.uniform(k3, shape2, dtype=jnp.float32)
    o2 = jax.block_until_ready(weighted_mse_loss(i2, t2, w2))
    r2 = (i2 - t2) ** 2 * w2
    assert o2.shape == shape2
    assert jnp.allclose(o2, r2, atol=1e-6, rtol=1e-6), "mismatch vs reference (tail path)"

    print("KERNEL_OK")
</pallas_src>

<mosaic_0001>
module attributes {stable_mosaic.version = 11 : i64} {
  func.func @_wmse_kernel(%arg0: i32, %arg1: memref<8x256xf32, #tpu.memory_space<vmem>>, %arg2: memref<8x256xf32, #tpu.memory_space<vmem>>, %arg3: memref<8x256xf32, #tpu.memory_space<vmem>>, %arg4: memref<8x256xf32, #tpu.memory_space<vmem>>) attributes {dimension_semantics = [#tpu.dimension_semantics<parallel>], iteration_bounds = array<i64: 1>, scalar_prefetch = 0 : i64, scratch_operands = 0 : i64, tpu.core_type = #tpu.core_type<tc>, window_params = [{transform_indices = @transform_0, window_bounds = array<i64: 8, 256>}, {transform_indices = @transform_1, window_bounds = array<i64: 8, 256>}, {transform_indices = @transform_2, window_bounds = array<i64: 8, 256>}, {transform_indices = @transform_3, window_bounds = array<i64: 8, 256>}]} {
    %c0 = arith.constant 0 : index
    %c0_0 = arith.constant 0 : index
    %0 = vector.load %arg1[%c0, %c0_0] : memref<8x256xf32, #tpu.memory_space<vmem>>, vector<8x256xf32>
    %c0_1 = arith.constant 0 : index
    %c0_2 = arith.constant 0 : index
    %1 = vector.load %arg2[%c0_1, %c0_2] : memref<8x256xf32, #tpu.memory_space<vmem>>, vector<8x256xf32>
    %c0_3 = arith.constant 0 : index
    %c0_4 = arith.constant 0 : index
    %2 = vector.load %arg3[%c0_3, %c0_4] : memref<8x256xf32, #tpu.memory_space<vmem>>, vector<8x256xf32>
    %3 = arith.subf %0, %1 : vector<8x256xf32>
    %4 = arith.mulf %3, %3 : vector<8x256xf32>
    %5 = arith.mulf %4, %2 : vector<8x256xf32>
    %c0_5 = arith.constant 0 : index
    %c0_6 = arith.constant 0 : index
    %6 = vector.load %arg4[%c0_5, %c0_6] : memref<8x256xf32, #tpu.memory_space<vmem>>, vector<8x256xf32>
    tpu.vector_store %arg4[%c0_5, %c0_6], %5 {strides = array<i32>} : memref<8x256xf32, #tpu.memory_space<vmem>>, vector<8x256xf32>,
    return
  }
  func.func @transform_0(%arg0: i32) -> (i32, i32) {
    %c0_i32 = arith.constant 0 : i32
    %c0_i32_0 = arith.constant 0 : i32
    return %arg0, %c0_i32 : i32, i32
  }
  func.func @transform_1(%arg0: i32) -> (i32, i32) {
    %c0_i32 = arith.constant 0 : i32
    %c0_i32_0 = arith.constant 0 : i32
    return %arg0, %c0_i32 : i32, i32
  }
  func.func @transform_2(%arg0: i32) -> (i32, i32) {
    %c0_i32 = arith.constant 0 : i32
    %c0_i32_0 = arith.constant 0 : i32
    return %arg0, %c0_i32 : i32, i32
  }
  func.func @transform_3(%arg0: i32) -> (i32, i32) {
    %c0_i32 = arith.constant 0 : i32
    %c0_i32_0 = arith.constant 0 : i32
    return %arg0, %c0_i32 : i32, i32
  }
}

</mosaic_0001>

<bundles_post_ra>
// kernel: tpu_custom_call.1
= control target key start
LH: loop header
LB: loop body
LE: loop exit
PB: predicated region body
PF: predicated region fallthrough
CT: control target
= control target key end

     0   :  { %8 = vsyncpa [#allocation3], 0  ;;  %s250_s0 = inlined_call_operand.hbm [shape: f32[8,256], index: 0, kind: input, shape index: {}]   ;;  %s251_s1 = inlined_call_operand.hbm [shape: f32[8,256], index: 1, kind: input, shape index: {}]   ;;  %s252_s2 = inlined_call_operand.hbm [shape: f32[8,256], index: 2, kind: input, shape index: {}]   ;;  %s253_s3 = inlined_call_operand.hbm [shape: f32[8,256], index: 3, kind: output, shape index: {}]  }
   0x1   :  { %9 = vsyncpa [#allocation6], 0 }
   0x2   :  { %10 = vsyncpa [#allocation4], 0  ;;  %s178_s12 = smov [#allocation5]   ;;  %s179_s14 = smov [#allocation2]  }
   0x3   :  { %s27_s13 = sshll.u32 %s178_s12, 4  ;;  %s17_s15 = sshll.u32 %s179_s14, 4  ;;  %s28_s13 = int_to_ptr.vmem [resolvable:$true] %s27_s13  ;;  %s18_s15 = int_to_ptr.vmem [resolvable:$true] %s17_s15 }
   0x4   :  { %s84_s18 = scalar_lea.hbm %s251_s1, 256 }
   0x5   :  { %p85_p0 = scmp.ne.s32.totalorder %s251_s1, %s84_s18  ;;  %p88_p1 = scmp.lt.u32.totalorder %s84_s18, %s251_s1 }
   0x7   :  { %p90_p2 = pnand %p88_p1, %p85_p0 }
   0x9   :  { %93 = shalt.err (!%p90_p2)
}
   0xa   :  { %s94_s23 = scalar_lea.vmem %s28_s13, 256  ;;  %p99_p4 = scmp.lt.s32.totalorder %s28_s13, %s28_s13 }
   0xb   :  { %p95_p3 = scmp.ne.s32.totalorder %s28_s13, %s94_s23  ;;  %p100_p5 = scmp.lt.s32.totalorder %s94_s23, %s94_s23 }
   0xd   :  { %p101_p6 = por %p100_p5, %p99_p4 }
   0xf   :  { %p102_p7 = pnand %p101_p6, %p95_p3 }
  0x11   :  { %105 = shalt.err (!%p102_p7)
}
  0x12   :  { %30 = dma.hbm_to_vmem [thread:$0]  %s251_s1, 256, %s28_s13, [#allocation6]  }
  0x13   :  { %s106_s28 = scalar_lea.hbm %s250_s0, 256 }
  0x14   :  { %p107_p8 = scmp.ne.s32.totalorder %s250_s0, %s106_s28  ;;  %p110_p9 = scmp.lt.u32.totalorder %s106_s28, %s250_s0 }
  0x16   :  { %p112_p10 = pnand %p110_p9, %p107_p8 }
  0x18   :  { %115 = shalt.err (!%p112_p10)
}
  0x19   :  { %s116_s6 = scalar_lea.vmem %s18_s15, 256  ;;  %p121_p12 = scmp.lt.s32.totalorder %s18_s15, %s18_s15 }
  0x1a   :  { %p117_p11 = scmp.ne.s32.totalorder %s18_s15, %s116_s6  ;;  %p122_p13 = scmp.lt.s32.totalorder %s116_s6, %s116_s6 }
  0x1c   :  { %p123_p0 = por %p122_p13, %p121_p12 }
  0x1e   :  { %p124_p1 = pnand %p123_p0, %p117_p11 }
  0x20   :  { %127 = shalt.err (!%p124_p1)
}
  0x21   :  { %20 = dma.hbm_to_vmem [thread:$0]  %s250_s0, 256, %s18_s15, [#allocation3]  }
  0x22   :  { %s180_s8 = smov [#allocation7]   ;;  %s128_s12 = scalar_lea.hbm %s252_s2, 256 }
  0x23   :  { %s37_s9 = sshll.u32 %s180_s8, 4  ;;  %p129_p2 = scmp.ne.s32.totalorder %s252_s2, %s128_s12  ;;  %s38_s9 = int_to_ptr.vmem [resolvable:$true] %s37_s9 }
  0x24   :  { %p132_p3 = scmp.lt.u32.totalorder %s128_s12, %s252_s2 }
  0x26   :  { %p134_p4 = pnand %p132_p3, %p129_p2 }
  0x28   :  { %137 = shalt.err (!%p134_p4)
}
  0x29   :  { %s138_s18 = scalar_lea.vmem %s38_s9, 256  ;;  %p143_p6 = scmp.lt.s32.totalorder %s38_s9, %s38_s9 }
  0x2a   :  { %p139_p5 = scmp.ne.s32.totalorder %s38_s9, %s138_s18  ;;  %p144_p7 = scmp.lt.s32.totalorder %s138_s18, %s138_s18 }
  0x2c   :  { %p145_p8 = por %p144_p7, %p143_p6 }
  0x2e   :  { %p146_p9 = pnand %p145_p8, %p139_p5 }
  0x30   :  { %149 = shalt.err (!%p146_p9)
}
  0x31   :  { %40 = dma.hbm_to_vmem [thread:$0]  %s252_s2, 256, %s38_s9, [#allocation6]  }
  0x32   :  { %172 = dma.done.wait [#allocation3], 256  }
  0x33   :  { %173 = vsyncadd [#allocation3], 4294967040 }
  0x34   :  { %174 = dma.done.wait [#allocation6], 512  }
  0x35   :  { %175 = vsyncadd [#allocation6], 4294966784  ;;  %v50_v0 = vld [vmem:[#allocation2] sm:$0xff]  ;;  %v52_v1 = vld [vmem:[#allocation5] sm:$0xff]  ;;  %s181_s19 = smov [#allocation8]  }
  0x36   :  { %v56_v2 = vsub.f32 %v50_v0, %v52_v1  ;;  %v51_v3 = vld [vmem:[#allocation2 + $0x8] sm:$0xff]  ;;  %v53_v4 = vld [vmem:[#allocation5 + $0x8] sm:$0xff]  ;;  %v54_v5 = vld [vmem:[#allocation7] sm:$0xff]  ;;  %s70_s20 = sshll.u32 %s181_s19, 4  ;;  %s71_s20 = int_to_ptr.vmem [resolvable:$true] %s70_s20 }
  0x37   :  { %v57_v6 = vsub.f32 %v51_v3, %v53_v4  ;;  %v55_v8 = vld [vmem:[#allocation7 + $0x8] sm:$0xff]  ;;  %s150_s2 = scalar_lea.vmem %s71_s20, 256  ;;  %p155_p11 = scmp.lt.s32.totalorder %s71_s20, %s71_s20 }
  0x38   :  { %v58_v7 = vmul.f32 %v56_v2, %v56_v2  ;;  %p151_p10 = scmp.ne.s32.totalorder %s71_s20, %s150_s2  ;;  %p156_p12 = scmp.lt.s32.totalorder %s150_s2, %s150_s2 }
  0x39   :  { %v59_v9 = vmul.f32 %v57_v6, %v57_v6 }
  0x3a   :  { %v60_v10 = vmul.f32 %v58_v7, %v54_v5  ;;  %p157_p13 = por %p156_p12, %p155_p11 }
  0x3b   :  { %v61_v11 = vmul.f32 %v59_v9, %v55_v8 }
  0x3c   :  { %62 = vst [vmem:[#allocation8] sm:$0xff] %v60_v10  ;;  %p158_p0 = pnand %p157_p13, %p151_p10 }
  0x3d   :  { %63 = vst [vmem:[#allocation8 + $0x8] sm:$0xff] %v61_v11 }
  0x3e   :  { %161 = shalt.err (!%p158_p0)
}
  0x3f   :  { %s162_s23 = scalar_lea.hbm %s253_s3, 256 }
  0x40   :  { %p163_p1 = scmp.ne.s32.totalorder %s253_s3, %s162_s23  ;;  %p166_p2 = scmp.lt.u32.totalorder %s162_s23, %s253_s3 }
  0x42   :  { %p168_p3 = pnand %p166_p2, %p163_p1 }
  0x44   :  { %171 = shalt.err (!%p168_p3)
}
  0x45   :  { %73 = dma.vmem_to_hbm [thread:$0]  %s71_s20, 256, %s253_s3, [#allocation4]  }
  0x46   :  { %176 = dma.done.wait [#allocation4], 256  }
  0x47   :  { %177 = vsyncadd [#allocation4], 4294967040 }
  0x48   :  { %77 = vsyncpa [#allocation3], 1 }
  0x49   :  { %78 = vsyncpa [#allocation6], 1 }
  0x4a   :  { %79 = vsyncpa [#allocation4], 1 }

</bundles_post_ra>
